<compile_context>
chip_gen: v7x
topology: tpu7x:2x2x1
jax: 0.10.0
libtpu: 0.0.40
codegen_flags: <defaults>
</compile_context>

<pallas_src>
import math

import jax
import jax.numpy as jnp
from jax.experimental import pallas as pl
from jax.experimental.pallas import tpu as pltpu


def actor_kernel(obs_ref, w1_ref, b1_ref, w2_ref, b2_ref, w3_ref, b3_ref, out_ref):
    # One batch tile per grid step: three MXU matmuls (bf16 operands, f32 accumulate),
    # VPU bias/relu and EUP tanh in f32, masked store of the action_dim output lanes.
    x = obs_ref[...].astype(jnp.bfloat16)

    h1 = jnp.dot(x, w1_ref[...], preferred_element_type=jnp.float32) + b1_ref[...]
    h1 = jnp.maximum(h1, 0.0)

    h2 = jnp.dot(h1.astype(jnp.bfloat16), w2_ref[...],
                 preferred_element_type=jnp.float32) + b2_ref[...]
    h2 = jnp.maximum(h2, 0.0)

    h3 = jnp.dot(h2.astype(jnp.bfloat16), w3_ref[...],
                 preferred_element_type=jnp.float32) + b3_ref[...]
    y = jnp.tanh(h3) * 10.0
    out_ref[...] = y[:, :out_ref.shape[1]].astype(out_ref.dtype)


def _tile_rows(batch, tm):
    """Rows per batch tile: multiple of 8, and >=2 tiles when batch > 8 (v7x megacore)."""
    if batch <= 8:
        return batch                          # single tile == full array (always legal)
    half = (-(-batch // 2) + 7) // 8 * 8      # round_up(ceil(batch / 2), 8)
    return max(8, min(tm, half))


def actor_forward(obs, params, action_dim, *, tm=1024, out_dtype=jnp.float32):
    """Batch-tiled forward pass. obs: [B, obs_dim] f32. Returns [B, action_dim] out_dtype."""
    w1, b1, w2, b2, w3, b3 = params
    B, obs_dim = obs.shape

    tm = max(256, min(int(tm), 2048))   # TM<=2048 keeps the f32 (TM,512) intermediate small
    tm_eff = _tile_rows(B, tm)
    grid = (pl.cdiv(B, tm_eff),)        # no wrapper padding: the edge block is masked

    const = lambda i: (0, 0)            # weights/biases: same block every step -> fetched once
    out = pl.pallas_call(
        actor_kernel,
        out_shape=jax.ShapeDtypeStruct((B, action_dim), out_dtype),
        grid_spec=pltpu.PrefetchScalarGridSpec(
            num_scalar_prefetch=0,
            grid=grid,
            in_specs=[
                pl.BlockSpec((tm_eff, obs_dim), lambda i: (i, 0)),   # obs tile (streamed)
                pl.BlockSpec(w1.shape, const),
                pl.BlockSpec(b1.shape, const),
                pl.BlockSpec(w2.shape, const),
                pl.BlockSpec(b2.shape, const),
                pl.BlockSpec(w3.shape, const),
                pl.BlockSpec(b3.shape, const),
            ],
            out_specs=pl.BlockSpec((tm_eff, action_dim), lambda i: (i, 0)),
        ),
        compiler_params=pltpu.CompilerParams(
            dimension_semantics=("parallel",),      # shard batch tiles across TCs (v7x)
            vmem_limit_bytes=32 * 1024 * 1024,      # lift v5e's 16 MiB scoped default
        ),
    )(obs, w1, b1, w2, b2, w3, b3)
    return out


def init_actor_params(key, obs_dim, action_dim):
    """nn.Linear-style U(-1/sqrt(fan_in), 1/sqrt(fan_in)) init.

    Weights stored bf16 as [in, out]; biases f32 as [1, out]. Layer 3 is zero-padded to a
    multiple of 128 output columns (MXU/lane friendly); the kernel stores only action_dim lanes.
    """
    act_pad = -(-action_dim // 128) * 128
    dims = [(obs_dim, 512), (512, 128), (128, action_dim)]
    params = []
    for i, (fan_in, fan_out) in enumerate(dims):
        kw, kb = jax.random.split(jax.random.fold_in(key, i))
        bound = 1.0 / math.sqrt(fan_in)
        w = jax.random.uniform(kw, (fan_in, fan_out), jnp.float32, -bound, bound)
        b = jax.random.uniform(kb, (1, fan_out), jnp.float32, -bound, bound)
        if i == 2 and fan_out < act_pad:
            w = jnp.pad(w, ((0, 0), (0, act_pad - fan_out)))
            b = jnp.pad(b, ((0, 0), (0, act_pad - fan_out)))
        params += [w.astype(jnp.bfloat16), b]
    return tuple(params)


def actor_reference(obs, params, action_dim):
    """Pure-JAX reference mirroring the kernel's bf16-operand / f32-accumulate policy."""
    w1, b1, w2, b2, w3, b3 = params
    h1 = jnp.maximum(jnp.dot(obs.astype(jnp.bfloat16), w1,
                             preferred_element_type=jnp.float32) + b1, 0.0)
    h2 = jnp.maximum(jnp.dot(h1.astype(jnp.bfloat16), w2,
                             preferred_element_type=jnp.float32) + b2, 0.0)
    h3 = jnp.dot(h2.astype(jnp.bfloat16), w3,
                 preferred_element_type=jnp.float32) + b3
    return (jnp.tanh(h3) * 10.0)[:, :action_dim]


if __name__ == "__main__":
    obs_dim, action_dim = 32, 8
    key = jax.random.PRNGKey(0)
    k_obs, k_obs2, k_params = jax.random.split(key, 3)
    params = init_actor_params(k_params, obs_dim, action_dim)

    # Tiny batch: single full-array tile (grid=(1,), block rows == B).
    obs_small = jax.random.normal(k_obs, (2, obs_dim), jnp.float32)
    out_small = jax.block_until_ready(actor_forward(obs_small, params, action_dim))
    ref_small = actor_reference(obs_small, params, action_dim)
    assert out_small.shape == (2, action_dim)
    assert jnp.allclose(out_small, ref_small, atol=5e-3, rtol=5e-3), "small-batch mismatch"

    # Medium batch, not a tile multiple: two tiles (v7x megacore path) + masked edge block.
    obs_big = jax.random.normal(k_obs2, (300, obs_dim), jnp.float32)
    out_big = jax.block_until_ready(actor_forward(obs_big, params, action_dim))
    ref_big = actor_reference(obs_big, params, action_dim)
    assert out_big.shape == (300, action_dim)
    assert jnp.allclose(out_big, ref_big, atol=5e-3, rtol=5e-3), "large-batch mismatch"

    print("KERNEL_OK")
</pallas_src>

<mosaic_0001>
module attributes {stable_mosaic.version = 11 : i64} {
  func.func @actor_kernel(%arg0: i32, %arg1: memref<2x32xf32, #tpu.memory_space<vmem>>, %arg2: memref<32x512xbf16, #tpu.memory_space<vmem>>, %arg3: memref<1x512xf32, #tpu.memory_space<vmem>>, %arg4: memref<512x128xbf16, #tpu.memory_space<vmem>>, %arg5: memref<1x128xf32, #tpu.memory_space<vmem>>, %arg6: memref<128x128xbf16, #tpu.memory_space<vmem>>, %arg7: memref<1x128xf32, #tpu.memory_space<vmem>>, %arg8: memref<2x8xf32, #tpu.memory_space<vmem>>) attributes {dimension_semantics = [#tpu.dimension_semantics<parallel>], iteration_bounds = array<i64: 1>, scalar_prefetch = 0 : i64, scratch_operands = 0 : i64, tpu.core_type = #tpu.core_type<tc>, window_params = [{transform_indices = @transform_0, window_bounds = array<i64: 2, 32>}, {pipeline_mode = #tpu.pipeline_mode<synchronous>, transform_indices = @transform_1, window_bounds = array<i64: 32, 512>}, {pipeline_mode = #tpu.pipeline_mode<synchronous>, transform_indices = @transform_2, window_bounds = array<i64: 1, 512>}, {pipeline_mode = #tpu.pipeline_mode<synchronous>, transform_indices = @transform_3, window_bounds = array<i64: 512, 128>}, {pipeline_mode = #tpu.pipeline_mode<synchronous>, transform_indices = @transform_4, window_bounds = array<i64: 1, 128>}, {pipeline_mode = #tpu.pipeline_mode<synchronous>, transform_indices = @transform_5, window_bounds = array<i64: 128, 128>}, {pipeline_mode = #tpu.pipeline_mode<synchronous>, transform_indices = @transform_6, window_bounds = array<i64: 1, 128>}, {transform_indices = @transform_7, window_bounds = array<i64: 2, 8>}]} {
    %c0 = arith.constant 0 : index
    %c0_0 = arith.constant 0 : index
    %0 = vector.load %arg1[%c0, %c0_0] : memref<2x32xf32, #tpu.memory_space<vmem>>, vector<2x32xf32>
    %1 = arith.truncf %0 : vector<2x32xf32> to vector<2x32xbf16>
    %c0_1 = arith.constant 0 : index
    %c0_2 = arith.constant 0 : index
    %2 = vector.load %arg2[%c0_1, %c0_2] : memref<32x512xbf16, #tpu.memory_space<vmem>>, vector<32x512xbf16>
    %cst = arith.constant dense<0.000000e+00> : vector<2x512xf32>
    %3 = tpu.matmul %1, %2, %cst {dimension_numbers = #tpu.dot_dimension_numbers<[1], [0], [0], [1], [0, 0, 1, 1], [], []>} : vector<2x32xbf16>, vector<32x512xbf16>, vector<2x512xf32> -> vector<2x512xf32>
    %c0_3 = arith.constant 0 : index
    %c0_4 = arith.constant 0 : index
    %4 = vector.load %arg3[%c0_3, %c0_4] : memref<1x512xf32, #tpu.memory_space<vmem>>, vector<1x512xf32>
    %5 = vector.broadcast %4 : vector<1x512xf32> to vector<2x512xf32>
    %6 = arith.addf %3, %5 : vector<2x512xf32>
    %cst_5 = arith.constant 0.000000e+00 : f32
    %7 = vector.broadcast %cst_5 : f32 to vector<2x512xf32>
    %8 = arith.maximumf %6, %7 : vector<2x512xf32>
    %9 = arith.truncf %8 : vector<2x512xf32> to vector<2x512xbf16>
    %c0_6 = arith.constant 0 : index
    %c0_7 = arith.constant 0 : index
    %10 = vector.load %arg4[%c0_6, %c0_7] : memref<512x128xbf16, #tpu.memory_space<vmem>>, vector<512x128xbf16>
    %cst_8 = arith.constant dense<0.000000e+00> : vector<2x128xf32>
    %11 = tpu.matmul %9, %10, %cst_8 {dimension_numbers = #tpu.dot_dimension_numbers<[1], [0], [0], [1], [0, 0, 1, 1], [], []>} : vector<2x512xbf16>, vector<512x128xbf16>, vector<2x128xf32> -> vector<2x128xf32>
    %c0_9 = arith.constant 0 : index
    %c0_10 = arith.constant 0 : index
    %12 = vector.load %arg5[%c0_9, %c0_10] : memref<1x128xf32, #tpu.memory_space<vmem>>, vector<1x128xf32>
    %13 = vector.broadcast %12 : vector<1x128xf32> to vector<2x128xf32>
    %14 = arith.addf %11, %13 : vector<2x128xf32>
    %cst_11 = arith.constant 0.000000e+00 : f32
    %15 = vector.broadcast %cst_11 : f32 to vector<2x128xf32>
    %16 = arith.maximumf %14, %15 : vector<2x128xf32>
    %17 = arith.truncf %16 : vector<2x128xf32> to vector<2x128xbf16>
    %c0_12 = arith.constant 0 : index
    %c0_13 = arith.constant 0 : index
    %18 = vector.load %arg6[%c0_12, %c0_13] : memref<128x128xbf16, #tpu.memory_space<vmem>>, vector<128x128xbf16>
    %cst_14 = arith.constant dense<0.000000e+00> : vector<2x128xf32>
    %19 = tpu.matmul %17, %18, %cst_14 {dimension_numbers = #tpu.dot_dimension_numbers<[1], [0], [0], [1], [0, 0, 1, 1], [], []>} : vector<2x128xbf16>, vector<128x128xbf16>, vector<2x128xf32> -> vector<2x128xf32>
    %c0_15 = arith.constant 0 : index
    %c0_16 = arith.constant 0 : index
    %20 = vector.load %arg7[%c0_15, %c0_16] : memref<1x128xf32, #tpu.memory_space<vmem>>, vector<1x128xf32>
    %21 = vector.broadcast %20 : vector<1x128xf32> to vector<2x128xf32>
    %22 = arith.addf %19, %21 : vector<2x128xf32>
    %23 = math.tanh %22 : vector<2x128xf32>
    %cst_17 = arith.constant 1.000000e+01 : f32
    %24 = vector.broadcast %cst_17 : f32 to vector<2x128xf32>
    %25 = arith.mulf %23, %24 : vector<2x128xf32>
    %26 = vector.extract_strided_slice %25 {offsets = [0, 0], sizes = [2, 8], strides = [1, 1]} : vector<2x128xf32> to vector<2x8xf32>
    %c0_18 = arith.constant 0 : index
    %c0_19 = arith.constant 0 : index
    %27 = vector.load %arg8[%c0_18, %c0_19] : memref<2x8xf32, #tpu.memory_space<vmem>>, vector<2x8xf32>
    tpu.vector_store %arg8[%c0_18, %c0_19], %26 {strides = array<i32>} : memref<2x8xf32, #tpu.memory_space<vmem>>, vector<2x8xf32>,
    return
  }
  func.func @transform_0(%arg0: i32) -> (i32, i32) {
    %c0_i32 = arith.constant 0 : i32
    %c0_i32_0 = arith.constant 0 : i32
    return %arg0, %c0_i32 : i32, i32
  }
  func.func @transform_1(%arg0: i32) -> (i32, i32) {
    %c0_i32 = arith.constant 0 : i32
    %c0_i32_0 = arith.constant 0 : i32
    %c0_i32_1 = arith.constant 0 : i32
    return %c0_i32, %c0_i32_0 : i32, i32
  }
  func.func @transform_2(%arg0: i32) -> (i32, i32) {
    %c0_i32 = arith.constant 0 : i32
    %c0_i32_0 = arith.constant 0 : i32
    %c0_i32_1 = arith.constant 0 : i32
    return %c0_i32, %c0_i32_0 : i32, i32
  }
  func.func @transform_3(%arg0: i32) -> (i32, i32) {
    %c0_i32 = arith.constant 0 : i32
    %c0_i32_0 = arith.constant 0 : i32
    %c0_i32_1 = arith.constant 0 : i32
    return %c0_i32, %c0_i32_0 : i32, i32
  }
  func.func @transform_4(%arg0: i32) -> (i32, i32) {
    %c0_i32 = arith.constant 0 : i32
    %c0_i32_0 = arith.constant 0 : i32
    %c0_i32_1 = arith.constant 0 : i32
    return %c0_i32, %c0_i32_0 : i32, i32
  }
  func.func @transform_5(%arg0: i32) -> (i32, i32) {
    %c0_i32 = arith.constant 0 : i32
    %c0_i32_0 = arith.constant 0 : i32
    %c0_i32_1 = arith.constant 0 : i32
    return %c0_i32, %c0_i32_0 : i32, i32
  }
  func.func @transform_6(%arg0: i32) -> (i32, i32) {
    %c0_i32 = arith.constant 0 : i32
    %c0_i32_0 = arith.constant 0 : i32
    %c0_i32_1 = arith.constant 0 : i32
    return %c0_i32, %c0_i32_0 : i32, i32
  }
  func.func @transform_7(%arg0: i32) -> (i32, i32) {
    %c0_i32 = arith.constant 0 : i32
    %c0_i32_0 = arith.constant 0 : i32
    return %arg0, %c0_i32 : i32, i32
  }
}

</mosaic_0001>

<bundles_post_ra>
// kernel: tpu_custom_call.1
= control target key start
LH: loop header
LB: loop body
LE: loop exit
PB: predicated region body
PF: predicated region fallthrough
CT: control target
= control target key end

     0   :  { %12 = vsyncpa [#allocation3], 0  ;;  %s1156_s0 = inlined_call_operand.hbm [shape: f32[2,32], index: 0, kind: input, shape index: {}]   ;;  %s1157_s1 = inlined_call_operand.hbm [shape: bf16[32,512], index: 1, kind: input, shape index: {}]   ;;  %s1158_s2 = inlined_call_operand.vmem [shape: f32[1,512], index: 2, kind: input, shape index: {}]   ;;  %s1159_s3 = inlined_call_operand.hbm [shape: bf16[512,128], index: 3, kind: input, shape index: {}]   ;;  %s1160_s4 = inlined_call_operand.vmem [shape: f32[1,128], index: 4, kind: input, shape index: {}]   ;;  %s1161_s5 = inlined_call_operand.hbm [shape: bf16[128,128], index: 5, kind: input, shape index: {}]   ;;  %s1162_s6 = inlined_call_operand.vmem [shape: f32[1,128], index: 6, kind: input, shape index: {}]   ;;  %s1163_s7 = inlined_call_operand.hbm [shape: f32[2,8], index: 7, kind: output, shape index: {}]  }
   0x1   :  { %13 = vsyncpa [#allocation6], 0 }
   0x2   :  { %14 = vsyncpa [#allocation9], 0 }
   0x3   :  { %15 = vsyncpa [#allocation4], 0  ;;  %s1033_s24 = smov [#allocation5]   ;;  %s915_s28 = scalar_lea.hbm %s1157_s1, 1024 }
   0x4   :  { %s31_s25 = sshll.u32 %s1033_s24, 4  ;;  %p916_p0 = scmp.ne.s32.totalorder %s1157_s1, %s915_s28  ;;  %s32_s25 = int_to_ptr.vmem [resolvable:$true] %s31_s25 }
   0x5   :  { %p919_p1 = scmp.lt.u32.totalorder %s915_s28, %s1157_s1 }
   0x7   :  { %p921_p2 = pnand %p919_p1, %p916_p0 }
   0x9   :  { %924 = shalt.err (!%p921_p2)
}
   0xa   :  { %s925_s10 = scalar_lea.vmem %s32_s25, 1024  ;;  %p930_p4 = scmp.lt.s32.totalorder %s32_s25, %s32_s25 }
   0xb   :  { %p926_p3 = scmp.ne.s32.totalorder %s32_s25, %s925_s10  ;;  %p931_p5 = scmp.lt.s32.totalorder %s925_s10, %s925_s10 }
   0xd   :  { %p932_p6 = por %p931_p5, %p930_p4 }
   0xf   :  { %p933_p7 = pnand %p932_p6, %p926_p3 }
  0x11   :  { %936 = shalt.err (!%p933_p7)
}
  0x12   :  { %s1034_s11 = smov 256   ;;  %s1035_s12 = smov 16  }
  0x13   :  { %37 = dma.hbm_to_vmem [thread:$0]  %s1157_s1, 1024, %s32_s25, [#allocation6], %s1034_s11, %s1034_s11, %s1035_s12  }
  0x14   :  { %s1036_s15 = smov [#allocation2]   ;;  %s1037_s17 = smov [#allocation7]  }
  0x15   :  { %s22_s16 = sshll.u32 %s1036_s15, 4  ;;  %s45_s18 = sshll.u32 %s1037_s17, 4  ;;  %s23_s16 = int_to_ptr.vmem [resolvable:$true] %s22_s16  ;;  %s46_s18 = int_to_ptr.vmem [resolvable:$true] %s45_s18 }
  0x16   :  { %s937_s21 = scalar_lea.hbm %s1156_s0, 32 }
  0x17   :  { %p938_p8 = scmp.ne.s32.totalorder %s1156_s0, %s937_s21  ;;  %p941_p9 = scmp.lt.u32.totalorder %s937_s21, %s1156_s0 }
  0x19   :  { %p943_p10 = pnand %p941_p9, %p938_p8 }
  0x1b   :  { %946 = shalt.err (!%p943_p10)
}
  0x1c   :  { %s947_s1 = scalar_lea.vmem %s23_s16, 32  ;;  %p952_p12 = scmp.lt.s32.totalorder %s23_s16, %s23_s16 }
  0x1d   :  { %p948_p11 = scmp.ne.s32.totalorder %s23_s16, %s947_s1  ;;  %p953_p13 = scmp.lt.s32.totalorder %s947_s1, %s947_s1 }
  0x1f   :  { %p954_p0 = por %p953_p13, %p952_p12 }
  0x21   :  { %p955_p1 = pnand %p954_p0, %p948_p11 }
  0x23   :  { %958 = shalt.err (!%p955_p1)
}
  0x24   :  { %25 = dma.hbm_to_vmem [thread:$0]  %s1156_s0, 32, %s23_s16, [#allocation3]  }
  0x25   :  { %s959_s30 = scalar_lea.hbm %s1159_s3, 4096 }
  0x26   :  { %p960_p2 = scmp.ne.s32.totalorder %s1159_s3, %s959_s30  ;;  %p963_p3 = scmp.lt.u32.totalorder %s959_s30, %s1159_s3 }
  0x28   :  { %p965_p4 = pnand %p963_p3, %p960_p2 }
  0x2a   :  { %968 = shalt.err (!%p965_p4)
}
  0x2b   :  { %s969_s12 = scalar_lea.vmem %s46_s18, 4096  ;;  %p974_p6 = scmp.lt.s32.totalorder %s46_s18, %s46_s18 }
  0x2c   :  { %p970_p5 = scmp.ne.s32.totalorder %s46_s18, %s969_s12  ;;  %p975_p7 = scmp.lt.s32.totalorder %s969_s12, %s969_s12 }
  0x2e   :  { %p976_p8 = por %p975_p7, %p974_p6 }
  0x30   :  { %p977_p9 = pnand %p976_p8, %p970_p5 }
  0x32   :  { %980 = shalt.err (!%p977_p9)
}
  0x33   :  { %s1038_s0 = smov 64   ;;  %s1039_s13 = smov 4  }
  0x34   :  { %51 = dma.hbm_to_vmem [thread:$0]  %s1159_s3, 4096, %s46_s18, [#allocation6], %s1038_s0, %s1038_s0, %s1039_s13  }
  0x35   :  { %s1040_s16 = smov [#allocation8]   ;;  %s981_s21 = scalar_lea.hbm %s1161_s5, 1024 }
  0x36   :  { %s59_s17 = sshll.u32 %s1040_s16, 4  ;;  %p982_p10 = scmp.ne.s32.totalorder %s1161_s5, %s981_s21  ;;  %s60_s17 = int_to_ptr.vmem [resolvable:$true] %s59_s17 }
  0x37   :  { %p985_p11 = scmp.lt.u32.totalorder %s981_s21, %s1161_s5 }
  0x39   :  { %p987_p12 = pnand %p985_p11, %p982_p10 }
  0x3b   :  { %990 = shalt.err (!%p987_p12)
}
  0x3c   :  { %s991_s1 = scalar_lea.vmem %s60_s17, 1024  ;;  %p996_p0 = scmp.lt.s32.totalorder %s60_s17, %s60_s17 }
  0x3d   :  { %p992_p13 = scmp.ne.s32.totalorder %s60_s17, %s991_s1  ;;  %p997_p1 = scmp.lt.s32.totalorder %s991_s1, %s991_s1 }
  0x3f   :  { %p998_p2 = por %p997_p1, %p996_p0 }
  0x41   :  { %p999_p3 = pnand %p998_p2, %p992_p13 }
  0x43   :  { %1002 = shalt.err (!%p999_p3)
}
  0x44   :  { %65 = dma.hbm_to_vmem [thread:$0]  %s1161_s5, 1024, %s60_s17, [#allocation9], %s1038_s0, %s1038_s0, %s1039_s13  }
  0x45   :  { %1025 = dma.done.wait [#allocation3], 32  }
  0x46   :  { %1026 = vsyncadd [#allocation3], 4294967264 }
  0x47   :  { %1027 = dma.done.wait [#allocation6], 5120  }
  0x48   :  { %1028 = vsyncadd [#allocation6], 4294962176 }
  0x49   :  { %1029 = dma.done.wait [#allocation9], 1024  }
  0x4a   :  { %1030 = vsyncadd [#allocation9], 4294966272  ;;  %v1041_v0 = vmov 0   ;;  %v861_v1 = vld [vmem:[#allocation5 + $0x4] ss:$16 sps:$4 sm:$0xff]   ;;  %vm153_vm0 = vcmask 261120   ;;  %v93_v44 = vlaneseq }
  0x4b   :  { %189 = vmatprep.mubr.bf16.mxu1 %v1041_v0  ;;  %v863_v2 = vld [vmem:[#allocation5] ss:$16 sps:$4 sm:$0xff]   ;;  %157 = vmatprep.subr.bf16.mxu1 %v861_v1  ;;  %v864_v3 = vld [vmem:[#allocation5 + $0x24] ss:$16 sps:$4 sm:$0xff]   ;;  %v81_v5 = vld [vmem:[#allocation2] sm:$0x3] }
  0x4c   :  { %v866_v4 = vld [vmem:[#allocation5 + $0x20] ss:$16 sps:$4 sm:$0xff]   ;;  %158 = vmatpush1.bf16.msra.mxu1 %v863_v2  ;;  %v869_v6 = vld [vmem:[#allocation5 + $0xc] ss:$16 sps:$4 sm:$0xff]   ;;  %v867_v7 = vld [vmem:[#allocation5 + $0x8] ss:$16 sps:$4 sm:$0xff]   ;;  %v82_v8 = vpack.c.bf16 %v81_v5, %v81_v5 }
  0x4d   :  { %159 = vmatprep.subr.bf16.mxu1 %v864_v3  ;;  %v872_v9 = vld [vmem:[#allocation5 + $0x2c] ss:$16 sps:$4 sm:$0xff]   ;;  %v873_v10 = vld [vmem:[#allocation7 + $0x40] sm:$0xff]   ;;  %v877_v14 = vld [vmem:[#allocation7 + $0x50] sm:$0xff]   ;;  %v1042_v43 = vmov 0.0   ;;  %v94_v45 = vshrl.u32 %v93_v44, 7 }
  0x4e   :  { %v874_v11 = vld [vmem:[#allocation7] sm:$0xff]   ;;  %776 = vmatprep.subr.bf16.mxu0 %v873_v10  ;;  %v875_v12 = vld [vmem:[#allocation7 + $0x48] sm:$0xff]   ;;  %v879_v17 = vld [vmem:[#allocation7 + $0x10] sm:$0xff]   ;;  %vm1043_vm1 = vmmov 0   ;;  %vm705_vm2 = vcmask 58368  }
  0x4f   :  { %777 = vmatpush3.bf16.msra.mxu0 %v874_v11  ;;  %v876_v13 = vld [vmem:[#allocation7 + $0x8] sm:$0xff]   ;;  %v878_v16 = vld [vmem:[#allocation7 + $0xc0] sm:$0xff]   ;;  %v881_v18 = vld [vmem:[#allocation7 + $0x58] sm:$0xff]   ;;  %v95_v46 = vsub.s32 0, %v94_v45  ;;  %v99_v48 = vsub.s32 1, %v94_v45  ;;  %v103_v54 = vsub.s32 2, %v94_v45 }
  0x50   :  { %160 = vmatpush1.bf16.msra.mxu1 %v866_v4  ;;  %778 = vmatprep.subr.bf16.mxu0 %v875_v12  ;;  %v870_v15 = vld [vmem:[#allocation5 + $0x28] ss:$16 sps:$4 sm:$0xff]   ;;  %v880_v19 = vld [vmem:[#allocation7 + $0x80] sm:$0xff]   ;;  %v886_v24 = vld [vmem:[#allocation7 + $0xd0] sm:$0xff]   ;;  %v107_v57 = vsub.s32 3, %v94_v45 }
  0x51   :  { %198 = vmatprep.subr.bf16.mxu1 %v869_v6  ;;  %v882_v20 = vld [vmem:[#allocation7 + $0xc8] sm:$0xff]   ;;  %v883_v21 = vld [vmem:[#allocation7 + $0x18] sm:$0xff]   ;;  %v885_v22 = vld [vmem:[#allocation7 + $0x60] sm:$0xff]  }
  0x52   :  { %v884_v23 = vld [vmem:[#allocation7 + $0x88] sm:$0xff]   ;;  %v887_v25 = vld [vmem:[#allocation7 + $0x20] sm:$0xff]   ;;  %v888_v27 = vld [vmem:[#allocation7 + $0x90] sm:$0xff]  }
  0x53   :  { %732 = vmatmul.mubr.msk.bf16.vlgmr.msra.gmra.mrb[0].mxu1 %vm153_vm0, %v82_v8  ;;  %779 = vmatpush3.bf16.msra.mxu0 %v876_v13  ;;  %v889_v26 = vld [vmem:[#allocation7 + $0x68] sm:$0xff]   ;;  %v890_v28 = vld [vmem:[#allocation7 + $0xd8] sm:$0xff]   ;;  %v893_v31 = vld [vmem:[#allocation7 + $0x70] sm:$0xff]  }
  0x54   :  { %199 = vmatpush1.bf16.msra.mxu1 %v867_v7  ;;  %230 = vmatprep.mubr.bf16.mxu1 %v1041_v0  ;;  %v891_v29 = vld [vmem:[#allocation7 + $0x28] sm:$0xff]   ;;  %v892_v30 = vld [vmem:[#allocation7 + $0x98] sm:$0xff]   ;;  %v894_v32 = vld [vmem:[#allocation7 + $0xe0] sm:$0xff]  }
  0x55   :  { %200 = vmatprep.subr.bf16.mxu1 %v872_v9  ;;  %780 = vmatprep.subr.bf16.mxu0 %v877_v14  ;;  %v895_v33 = vld [vmem:[#allocation7 + $0x30] sm:$0xff]   ;;  %v896_v34 = vld [vmem:[#allocation7 + $0xa0] sm:$0xff]   ;;  %v897_v35 = vld [vmem:[#allocation7 + $0x78] sm:$0xff]  }
  0x56   :  { %v898_v36 = vld [vmem:[#allocation7 + $0xe8] sm:$0xff]   ;;  %v899_v37 = vld [vmem:[#allocation7 + $0x38] sm:$0xff]   ;;  %v901_v39 = vld [vmem:[#allocation7 + $0xf0] sm:$0xff]  }
  0x57   :  { %781 = vmatpush3.bf16.msra.mxu0 %v879_v17  ;;  %v900_v38 = vld [vmem:[#allocation7 + $0xa8] sm:$0xff]   ;;  %v902_v40 = vld [vmem:[#allocation7 + $0xb0] sm:$0xff]   ;;  %v903_v41 = vld [vmem:[#allocation7 + $0xf8] sm:$0xff]  }
  0x58   :  { %201 = vmatpush1.bf16.msra.mxu1 %v870_v15  ;;  %782 = vmatprep.subr.bf16.mxu0 %v881_v18  ;;  %v904_v42 = vld [vmem:[#allocation7 + $0xb8] sm:$0xff]   ;;  %v905_v0 = vld [vmem:[#allocation8] sm:$0xff]   ;;  %v906_v7 = vld [vmem:[#allocation8 + $0x8] sm:$0xff]  }
  0x59   :  { %798 = vmatprep.subr.bf16.mxu1 %v878_v16  ;;  %v91_v47 = vld [vmem:[%s1158_s2] sm:$0xf]  ;;  %v909_v15 = vld [vmem:[#allocation8 + $0x20] sm:$0xff]   ;;  %v910_v16 = vld [vmem:[#allocation8 + $0x28] sm:$0xff]  }
  0x5a   :  { %v96_v49 = vrot.slane %v91_v47, %v95_v46  ;;  %v100_v50 = vrot.slane %v91_v47, %v99_v48  ;;  %v104_v61 = vrot.slane %v91_v47, %v103_v54  ;;  %v108_v63 = vrot.slane %v91_v47, %v107_v57  ;;  %v907_v12 = vld [vmem:[#allocation8 + $0x10] sm:$0xff]   ;;  %v908_v14 = vld [vmem:[#allocation8 + $0x18] sm:$0xff]  }
  0x5b   :  { %733 = vmatmul.mubr.msk.bf16.vlgmr.msra.gmra.mrb[4].mxu1 %vm153_vm0, %v82_v8  ;;  %783 = vmatpush3.bf16.msra.mxu0 %v883_v21  ;;  %v911_v17 = vld [vmem:[#allocation8 + $0x30] sm:$0xff]   ;;  %v912_v18 = vld [vmem:[#allocation8 + $0x38] sm:$0xff]  }
  0x5c   :  { %799 = vmatpush3.bf16.msra.mxu1 %v880_v19  ;;  %784 = vmatprep.subr.bf16.mxu0 %v885_v22 }
  0x5d   :  { %800 = vmatprep.subr.bf16.mxu1 %v882_v20 }
  0x5f   :  { %785 = vmatpush3.bf16.msra.mxu0 %v887_v25 }
  0x60   :  { %801 = vmatpush3.bf16.msra.mxu1 %v884_v23  ;;  %786 = vmatprep.subr.bf16.mxu0 %v889_v26 }
  0x61   :  { %802 = vmatprep.subr.bf16.mxu1 %v886_v24  ;;  %v734_v24 = vld [vmem:[%s1160_s4] ss:$0 sm:$0xff]  ;;  %s1044_s4 = smov [#allocation10]  }
  0x62   :  { %s713_s30 = sshll.u32 %s1044_s4, 4  ;;  %s714_s30 = int_to_ptr.vmem [resolvable:$true] %s713_s30 }
  0x63   :  { %787 = vmatpush3.bf16.msra.mxu0 %v891_v29  ;;  %s1003_s8 = scalar_lea.vmem %s714_s30, 32  ;;  %p1008_p5 = scmp.lt.s32.totalorder %s714_s30, %s714_s30 }
  0x64   :  { %803 = vmatpush3.bf16.msra.mxu1 %v888_v27  ;;  %788 = vmatprep.subr.bf16.mxu0 %v893_v31  ;;  %p1004_p4 = scmp.ne.s32.totalorder %s714_s30, %s1003_s8  ;;  %p1009_p6 = scmp.lt.s32.totalorder %s1003_s8, %s1003_s8 }
  0x65   :  { %804 = vmatprep.subr.bf16.mxu1 %v890_v28 }
  0x66   :  { %p1010_p7 = por %p1009_p6, %p1008_p5 }
  0x67   :  { %789 = vmatpush3.bf16.msra.mxu0 %v895_v33 }
  0x68   :  { %805 = vmatpush3.bf16.msra.mxu1 %v892_v30  ;;  %790 = vmatprep.subr.bf16.mxu0 %v897_v35  ;;  %p1011_p8 = pnand %p1010_p7, %p1004_p4 }
  0x69   :  { %806 = vmatprep.subr.bf16.mxu1 %v894_v32 }
  0x6b   :  { %791 = vmatpush3.bf16.msra.mxu0 %v899_v37 }
  0x6c   :  { %807 = vmatpush3.bf16.msra.mxu1 %v896_v34  ;;  %829 = vmatprep.subr.bf16.mxu0 %v1042_v43  ;;  %v767_v34 = vld [vmem:[%s1162_s6] ss:$0 sm:$0xff] }
  0x6d   :  { %808 = vmatprep.subr.bf16.mxu1 %v898_v36 }
  0x70   :  { %809 = vmatpush3.bf16.msra.mxu1 %v900_v38 }
  0x71   :  { %810 = vmatprep.subr.bf16.mxu1 %v901_v39 }
  0x74   :  { %811 = vmatpush3.bf16.msra.mxu1 %v902_v40 }
  0x75   :  { %812 = vmatprep.subr.bf16.mxu1 %v903_v41 }
  0x78   :  { %813 = vmatpush3.bf16.msra.mxu1 %v904_v42 }
 0x126   :  { %v191_v51 = vpop.f32.mrb[0].mxu1 }
 0x127   :  { %v192_v52 = vadd.f32 %v191_v51, %v96_v49  ;;  %v193_v53 = vpop.f32.mrb[1].mxu1 }
 0x128   :  { %v194_v55 = vadd.f32 %v193_v53, %v100_v50  ;;  %v195_v56 = vpop.f32.mrb[2].mxu1 }
 0x129   :  { %v239_v58 = vmax.f32 %v192_v52, 0.0  ;;  %v196_v59 = vpop.f32.mrb[3].mxu1 }
 0x12a   :  { %v240_v60 = vmax.f32 %v194_v55, 0.0 }
 0x12b   :  { %v243_v1 = vpack.c.bf16 %v239_v58, %v239_v58 }
 0x12c   :  { %v244_v62 = vpack.c.bf16 %v240_v60, %v240_v60 }
 0x12e   :  { %v232_v2 = vpop.f32.mrb[4].mxu1  ;;  %542 = vmatprep.mubr.bf16.mxu0 %v244_v62 }
 0x12f   :  { %v233_v3 = vadd.f32 %v232_v2, %v104_v61  ;;  %v234_v4 = vpop.f32.mrb[5].mxu1  ;;  %543 = vmatmul.mubr.bf16.vlgmr.msra.gmra.mrb[0].mxu0 %v243_v1 }
 0x130   :  { %v235_v5 = vadd.f32 %v234_v4, %v108_v63  ;;  %v236_v6 = vpop.f32.mrb[6].mxu1  ;;  %830 = vmatpush3.bf16.msra.mxu0 %v905_v0  ;;  %845 = vmatprep.mubr.msk.bf16.mxu0 %vm1043_vm1, %v1042_v43 }
 0x131   :  { %v241_v8 = vmax.f32 %v233_v3, 0.0  ;;  %v237_v9 = vpop.f32.mrb[7].mxu1  ;;  %831 = vmatprep.subr.bf16.mxu0 %v1042_v43 }
 0x132   :  { %v242_v10 = vmax.f32 %v235_v5, 0.0 }
 0x133   :  { %v245_v13 = vpack.c.bf16 %v241_v8, %v241_v8 }
 0x134   :  { %v246_v11 = vpack.c.bf16 %v242_v10, %v242_v10  ;;  %832 = vmatpush3.bf16.msra.mxu0 %v906_v7 }
 0x135   :  { %833 = vmatprep.subr.bf16.mxu0 %v1042_v43 }
 0x136   :  { %582 = vmatprep.mubr.bf16.mxu1 %v246_v11 }
 0x137   :  { %583 = vmatmul.mubr.bf16.vlgmr.msra.gmra.mrb[8].mxu1 %v245_v13 }
 0x138   :  { %834 = vmatpush3.bf16.msra.mxu0 %v907_v12 }
 0x139   :  { %835 = vmatprep.subr.bf16.mxu0 %v1042_v43 }
 0x13c   :  { %836 = vmatpush3.bf16.msra.mxu0 %v908_v14 }
 0x13d   :  { %837 = vmatprep.subr.bf16.mxu0 %v1042_v43 }
 0x140   :  { %838 = vmatpush3.bf16.msra.mxu0 %v909_v15 }
 0x141   :  { %839 = vmatprep.subr.bf16.mxu0 %v1042_v43 }
 0x144   :  { %840 = vmatpush3.bf16.msra.mxu0 %v910_v16 }
 0x145   :  { %841 = vmatprep.subr.bf16.mxu0 %v1042_v43 }
 0x148   :  { %842 = vmatpush3.bf16.msra.mxu0 %v911_v17 }
 0x149   :  { %843 = vmatprep.subr.bf16.mxu0 %v1042_v43 }
 0x14c   :  { %844 = vmatpush3.bf16.msra.mxu0 %v912_v18 }
 0x202   :  { %v792_v19 = vpop.f32.mrb[0].mxu0 }
 0x203   :  { %v793_v20 = vpop.f32.mrb[1].mxu0 }
 0x204   :  { %v794_v21 = vadd.f32 %v793_v20, %v792_v19  ;;  %v795_v22 = vpop.f32.mrb[2].mxu0 }
 0x205   :  { %v796_v23 = vpop.f32.mrb[3].mxu0 }
 0x206   :  { %v545_v27 = vadd.f32 %v794_v21, %v734_v24 }
 0x20a   :  { %v814_v25 = vpop.f32.mrb[8].mxu1 }
 0x20b   :  { %v815_v26 = vpop.f32.mrb[9].mxu1 }
 0x20c   :  { %v816_v28 = vadd.f32 %v815_v26, %v814_v25  ;;  %v817_v29 = vpop.f32.mrb[10].mxu1 }
 0x20d   :  { %v818_v30 = vpop.f32.mrb[11].mxu1 }
 0x20e   :  { %v585_v31 = vadd.f32 %v816_v28, %v545_v27 }
 0x210   :  { %v590_v32 = vmax.f32 %v585_v31, 0.0 }
 0x212   :  { %v591_v33 = vpack.c.bf16 %v590_v32, %v590_v32 }
 0x214   :  { %846 = vmatmul.mubr.bf16.vlgmr.msra.gmra.mrb[4].mxu0 %v591_v33 }
 0x2e7   :  { %v697_v35 = vpop.f32.mrb[4].mxu0 }
 0x2e8   :  { %v698_v36 = vadd.f32 %v767_v34, %v697_v35  ;;  %v847_v37 = vpop.f32.mrb[5].mxu0 }
 0x2e9   :  { %v700_v38 = vpop.f32.mrb[6].mxu0 }
 0x2ea   :  { %913 = vtanh.f32 %v698_v36  ;;  %v848_v39 = vpop.f32.mrb[7].mxu0 }
 0x2f4   :  { %v914_v40 = vpop.eup %913 }
 0x2f5   :  { %v704_v41 = vmul.f32 10.0, %v914_v40 }
 0x2f7   :  { %706 = vst.msk [vmem:[#allocation10] sm:$0x3] %vm705_vm2, %v704_v41 }
 0x2f8   :  { %1014 = shalt.err (!%p1011_p8)
}
 0x2f9   :  { %s1015_s10 = scalar_lea.hbm %s1163_s7, 32 }
 0x2fa   :  { %p1016_p9 = scmp.ne.s32.totalorder %s1163_s7, %s1015_s10  ;;  %p1019_p10 = scmp.lt.u32.totalorder %s1015_s10, %s1163_s7 }
 0x2fc   :  { %p1021_p11 = pnand %p1019_p10, %p1016_p9 }
 0x2fe   :  { %1024 = shalt.err (!%p1021_p11)
}
 0x2ff   :  { %716 = dma.vmem_to_hbm [thread:$0]  %s714_s30, 32, %s1163_s7, [#allocation4]  }
 0x300   :  { %1031 = dma.done.wait [#allocation4], 32  }
 0x301   :  { %1032 = vsyncadd [#allocation4], 4294967264 }
 0x302   :  { %720 = vsyncpa [#allocation3], 1 }
 0x303   :  { %721 = vsyncpa [#allocation6], 1 }
 0x304   :  { %722 = vsyncpa [#allocation9], 1 }
 0x305   :  { %723 = vsyncpa [#allocation4], 1 }

</bundles_post_ra>
